<compile_context>
chip_gen: v5e
topology: v5e:2x2
jax: 0.10.0
libtpu: 0.0.40
codegen_flags: <defaults>
</compile_context>

<pallas_src>
import jax
import jax.numpy as jnp
from jax.experimental import pallas as pl
from jax.experimental.pallas import tpu as pltpu

EPS = 1e-12                 # eps of the BERT-style LayerNorm in the reference
_MIB = 1024 * 1024
_ROW_ALIGN = 16             # sublane alignment covering f32 (8) and bf16 (16) tiling
_TMP_F32_BUFFERS = 3        # in-kernel f32 temporaries (x, xc, y) budgeted in VMEM
_HBM_BW_PER_TC = {2: 0.30e12, 3: 0.45e12, 4: 0.60e12,
                  5: 0.82e12, 6: 1.40e12, 7: 3.20e12}   # bytes/s per TensorCore


# ----------------------------------------------------------------------------
# Kernels
# ----------------------------------------------------------------------------
def _layernorm_kernel(x_ref, g_ref, b_ref, o_ref):
    """Unpacked path: one original row per kernel row (lane width = D)."""
    x = x_ref[...].astype(jnp.float32)
    u = jnp.mean(x, axis=-1, keepdims=True)
    xc = x - u
    s = jnp.mean(xc * xc, axis=-1, keepdims=True)
    y = xc * jax.lax.rsqrt(s + EPS)                      # EUP rsqrt, VALU mul
    o_ref[...] = (g_ref[...] * y + b_ref[...]).astype(o_ref.dtype)


def _layernorm_packed_kernel(x_ref, m_ref, g_ref, b_ref, o_ref):
    """Lane-dense path: p = 128 // D original rows per 128-lane kernel row.

    m_ref is the constant (128, 128) block-diagonal matrix with 1/D inside
    each DxD diagonal block, so x @ m gives each element its own row's mean
    (segmented reduce + broadcast in a single MXU op).  Both matmuls keep f32
    operands and f32 preferred_element_type for full accuracy.
    """
    x = x_ref[...].astype(jnp.float32)
    m = m_ref[...]
    u = jnp.dot(x, m, preferred_element_type=jnp.float32)        # segment mean
    xc = x - u
    v = jnp.dot(xc * xc, m, preferred_element_type=jnp.float32)  # segment var
    y = xc * jax.lax.rsqrt(v + EPS)
    o_ref[...] = (g_ref[...] * y + b_ref[...]).astype(o_ref.dtype)


# ----------------------------------------------------------------------------
# Hardware-aware tiling helpers
# ----------------------------------------------------------------------------
def _tpu_generation():
    try:
        kind = jax.devices()[0].device_kind.lower()
    except Exception:
        return 6
    for g in (7, 6, 5, 4, 3, 2):
        if f"v{g}" in kind:
            return g
    return 6


def _vmem_capacity_bytes(gen):
    try:
        cap = int(pltpu.get_tpu_info().vmem_capacity_bytes)
    except Exception:
        cap = 64 * _MIB                      # conservative (v7x per-TC size)
    if gen >= 7:
        cap = min(cap, 64 * _MIB)            # v7x: 64 MiB per TensorCore
    return max(cap, 16 * _MIB)


def _row_vmem_bytes(lane_width, in_itemsize, out_itemsize):
    """VMEM bytes per kernel row, using the PADDED lane width (review fix)."""
    lanes_padded = pl.cdiv(lane_width, 128) * 128
    return lanes_padded * (2 * in_itemsize + 2 * out_itemsize
                           + _TMP_F32_BUFFERS * 4)


def _pick_tile_rows(n_krows, lane_width, in_itemsize, out_itemsize,
                    gen, vmem_cap, num_tc):
    row_hbm = lane_width * (in_itemsize + out_itemsize)   # no lane padding in HBM
    row_vmem = _row_vmem_bytes(lane_width, in_itemsize, out_itemsize)

    # ~3.5 us of HBM traffic per grid step amortizes the ~0.35 us step cost.
    bw = _HBM_BW_PER_TC.get(gen, 1.4e12)
    traffic_target = int(3.5e-6 * bw)

    vmem_budget = max(min(int(0.70 * vmem_cap), vmem_cap - 12 * _MIB), 8 * _MIB)

    tile = traffic_target // max(row_hbm, 1)
    tile = min(tile, vmem_budget // max(row_vmem, 1))
    tile = max(_ROW_ALIGN, min(tile, 1 << 16))
    tile = min(tile, pl.cdiv(n_krows, _ROW_ALIGN) * _ROW_ALIGN)   # not >> array
    tile = max(_ROW_ALIGN, (tile // _ROW_ALIGN) * _ROW_ALIGN)

    # Load-balance the "parallel" grid axis across TensorCores (v7x has 2):
    # prefer a step count that is a multiple of the TC count, without
    # shrinking the tile below ~half its size.
    if num_tc > 1 and pl.cdiv(n_krows, tile) % num_tc:
        for cand in range(tile, max(_ROW_ALIGN, tile // 2) - 1, -_ROW_ALIGN):
            if pl.cdiv(n_krows, cand) % num_tc == 0:
                tile = cand
                break
    return tile, row_vmem


# ----------------------------------------------------------------------------
# Wrapper
# ----------------------------------------------------------------------------
def normalize_video(video, gamma, beta, *, tile_rows=None, pack=None,
                    out_dtype=jnp.float32):
    """Pallas implementation of NormalizeVideo.forward.

    video : any-rank array with video.shape[-1] == video_dim == gamma.shape[0]
            (kept in its native dtype; the kernel normalizes in f32)
    pack  : None (auto), or force the lane-dense packed path on/off.
            tile_rows, if given, is in *kernel-row* units (packed rows when
            the packed path is active).
    returns: `out_dtype` array of shape (-1, video.shape[-2], video.shape[-1]).
             out_dtype defaults to float32 to match the PyTorch reference
             (bf16 halves write traffic but deviates from the reference).
    """
    video = jnp.asarray(video)               # keep native dtype (no f32 pass here)
    T = video.shape[-2]
    D = video.shape[-1]
    x2d = video.reshape(-1, D)                # free row-major reshape
    n_rows = x2d.shape[0]

    gen = _tpu_generation()
    vmem_cap = _vmem_capacity_bytes(gen)
    num_tc = 2 if gen >= 7 else 1

    # Lane-dense packing decision (see header).  v5e stays unpacked.
    p = 128 // D if (D < 128 and 128 % D == 0) else 1
    if pack is None:
        pack = (gen >= 6) and p >= 2 and (n_rows % p == 0)
    pack = bool(pack) and p >= 2 and (n_rows % p == 0)
    # TODO(synk): when n_rows % p != 0, process the small remainder with a
    # second unpacked call instead of falling back entirely.

    in_itemsize = jnp.dtype(video.dtype).itemsize
    out_itemsize = jnp.dtype(out_dtype).itemsize
    g1 = jnp.asarray(gamma, jnp.float32).reshape(-1)
    b1 = jnp.asarray(beta, jnp.float32).reshape(-1)

    if pack:
        lane_w = p * D                        # == 128
        n_krows = n_rows // p
        x_k = x2d.reshape(n_krows, lane_w)    # free: rows are contiguous in HBM
        g_k = jnp.tile(g1, p).reshape(1, lane_w)
        b_k = jnp.tile(b1, p).reshape(1, lane_w)
        seg = jnp.arange(lane_w, dtype=jnp.int32) // D
        mean_mat = jnp.where(seg[:, None] == seg[None, :],
                             jnp.float32(1.0 / D), jnp.float32(0.0))
    else:
        lane_w = D
        n_krows = n_rows
        x_k = x2d
        g_k = g1.reshape(1, D)
        b_k = b1.reshape(1, D)
        mean_mat = None

    if tile_rows is None:
        tile_rows, row_vmem = _pick_tile_rows(
            n_krows, lane_w, in_itemsize, out_itemsize, gen, vmem_cap, num_tc)
    else:
        row_vmem = _row_vmem_bytes(lane_w, in_itemsize, out_itemsize)

    # VMEM limit derived from the actual (lane-padded) resident footprint,
    # with headroom, clamped to this generation's per-core capacity.
    vmem_limit = int(min(vmem_cap,
                         max(32 * _MIB, tile_rows * row_vmem * 3 // 2 + 4 * _MIB)))

    grid = (pl.cdiv(n_krows, tile_rows),)     # ragged last block handled by Pallas
    row_spec = pl.BlockSpec((tile_rows, lane_w), lambda i: (i, 0))
    vec_spec = pl.BlockSpec((1, lane_w), lambda i: (0, 0))

    if pack:
        kernel = _layernorm_packed_kernel
        in_specs = [row_spec,
                    pl.BlockSpec((lane_w, lane_w), lambda i: (0, 0)),
                    vec_spec, vec_spec]
        args = (x_k, mean_mat, g_k, b_k)
    else:
        kernel = _layernorm_kernel
        in_specs = [row_spec, vec_spec, vec_spec]
        args = (x_k, g_k, b_k)

    out_k = pl.pallas_call(
        kernel,
        out_shape=jax.ShapeDtypeStruct((n_krows, lane_w), out_dtype),
        grid_spec=pltpu.PrefetchScalarGridSpec(
            num_scalar_prefetch=0,
            grid=grid,
            in_specs=in_specs,
            out_specs=row_spec,
        ),
        compiler_params=pltpu.CompilerParams(
            dimension_semantics=("parallel",),
            vmem_limit_bytes=vmem_limit,
        ),
    )(*args)

    return out_k.reshape(-1, T, D)            # free: undo packing + (-1, T, D) view


# ----------------------------------------------------------------------------
# Reference + checks
# ----------------------------------------------------------------------------
def _reference(video, gamma, beta):
    video = jnp.asarray(video, jnp.float32)
    T, D = video.shape[-2], video.shape[-1]
    x = video.reshape(-1, T, D)
    u = jnp.mean(x, axis=-1, keepdims=True)
    s = jnp.mean((x - u) ** 2, axis=-1, keepdims=True)
    return gamma * ((x - u) / jnp.sqrt(s + EPS)) + beta


if __name__ == "__main__":
    key = jax.random.PRNGKey(0)
    k_v, k_g, k_b, k_v2, k_v3 = jax.random.split(key, 5)

    # task_config.video_dim = 32; video shaped (batch=2, pairs=4, seq=8, video_dim=32)
    B, P, T, D = 2, 4, 8, 32
    video = jax.random.normal(k_v, (B, P, T, D), dtype=jnp.float32)
    gamma = 1.0 + 0.1 * jax.random.normal(k_g, (D,), dtype=jnp.float32)
    beta = 0.1 * jax.random.normal(k_b, (D,), dtype=jnp.float32)
    ref = _reference(video, gamma, beta)

    # 1) Auto path (packed on v6e/v7x, unpacked on v5e) — f32, 1e-5 tolerance.
    out = jax.block_until_ready(normalize_video(video, gamma, beta))
    assert out.shape == (B * P, T, D), out.shape
    assert jnp.allclose(out, ref, atol=1e-5, rtol=1e-5)

    # 2) Forced-unpacked path cross-check (same tolerance).
    out_u = jax.block_until_ready(normalize_video(video, gamma, beta, pack=False))
    assert jnp.allclose(out_u, ref, atol=1e-5, rtol=1e-5)

    # 3) Forced lane-dense packed path (MXU block-diagonal segmented reduce),
    #    f32 operands -> must also hold 1e-5 against the reference.
    out_p = jax.block_until_ready(normalize_video(video, gamma, beta, pack=True))
    assert jnp.allclose(out_p, ref, atol=1e-5, rtol=1e-5)

    # 4) bf16 input + a grid that does NOT divide evenly (ragged last block,
    #    in-kernel f32 cast); tile_rows is in kernel-row units.
    video2 = jax.random.normal(k_v2, (10, 8, D), dtype=jnp.float32).astype(jnp.bfloat16)
    out2 = jax.block_until_ready(normalize_video(video2, gamma, beta, tile_rows=16))
    ref2 = _reference(video2.astype(jnp.float32), gamma, beta)
    assert out2.shape == (10, 8, D), out2.shape
    assert jnp.allclose(out2, ref2, atol=2e-2, rtol=2e-2)   # bf16 input tolerance

    # 5) Row count not divisible by the pack factor -> automatic unpacked fallback.
    video3 = jax.random.normal(k_v3, (3, 7, D), dtype=jnp.float32)
    out3 = jax.block_until_ready(normalize_video(video3, gamma, beta))
    ref3 = _reference(video3, gamma, beta)
    assert out3.shape == (3, 7, D), out3.shape
    assert jnp.allclose(out3, ref3, atol=1e-5, rtol=1e-5)

    print("KERNEL_OK")
</pallas_src>

<mosaic_0001>
module attributes {stable_mosaic.version = 11 : i64} {
  func.func @_layernorm_packed_kernel(%arg0: i32, %arg1: memref<16x128xf32, #tpu.memory_space<vmem>>, %arg2: memref<128x128xf32, #tpu.memory_space<vmem>>, %arg3: memref<1x128xf32, #tpu.memory_space<vmem>>, %arg4: memref<1x128xf32, #tpu.memory_space<vmem>>, %arg5: memref<16x128xf32, #tpu.memory_space<vmem>>) attributes {dimension_semantics = [#tpu.dimension_semantics<parallel>], iteration_bounds = array<i64: 1>, scalar_prefetch = 0 : i64, scratch_operands = 0 : i64, tpu.core_type = #tpu.core_type<tc>, window_params = [{transform_indices = @transform_0, window_bounds = array<i64: 16, 128>}, {pipeline_mode = #tpu.pipeline_mode<synchronous>, transform_indices = @transform_1, window_bounds = array<i64: 128, 128>}, {pipeline_mode = #tpu.pipeline_mode<synchronous>, transform_indices = @transform_2, window_bounds = array<i64: 1, 128>}, {pipeline_mode = #tpu.pipeline_mode<synchronous>, transform_indices = @transform_3, window_bounds = array<i64: 1, 128>}, {transform_indices = @transform_4, window_bounds = array<i64: 16, 128>}]} {
    %c0 = arith.constant 0 : index
    %c0_0 = arith.constant 0 : index
    %0 = vector.load %arg1[%c0, %c0_0] : memref<16x128xf32, #tpu.memory_space<vmem>>, vector<16x128xf32>
    %c0_1 = arith.constant 0 : index
    %c0_2 = arith.constant 0 : index
    %1 = vector.load %arg2[%c0_1, %c0_2] : memref<128x128xf32, #tpu.memory_space<vmem>>, vector<128x128xf32>
    %cst = arith.constant dense<0.000000e+00> : vector<16x128xf32>
    %2 = tpu.matmul %0, %1, %cst {dimension_numbers = #tpu.dot_dimension_numbers<[1], [0], [0], [1], [0, 0, 1, 1], [], []>} : vector<16x128xf32>, vector<128x128xf32>, vector<16x128xf32> -> vector<16x128xf32>
    %3 = arith.subf %0, %2 : vector<16x128xf32>
    %4 = arith.mulf %3, %3 : vector<16x128xf32>
    %cst_3 = arith.constant dense<0.000000e+00> : vector<16x128xf32>
    %5 = tpu.matmul %4, %1, %cst_3 {dimension_numbers = #tpu.dot_dimension_numbers<[1], [0], [0], [1], [0, 0, 1, 1], [], []>} : vector<16x128xf32>, vector<128x128xf32>, vector<16x128xf32> -> vector<16x128xf32>
    %cst_4 = arith.constant 9.99999996E-13 : f32
    %6 = vector.broadcast %cst_4 : f32 to vector<16x128xf32>
    %7 = arith.addf %5, %6 : vector<16x128xf32>
    %8 = math.rsqrt %7 : vector<16x128xf32>
    %9 = arith.mulf %3, %8 : vector<16x128xf32>
    %c0_5 = arith.constant 0 : index
    %c0_6 = arith.constant 0 : index
    %10 = vector.load %arg3[%c0_5, %c0_6] : memref<1x128xf32, #tpu.memory_space<vmem>>, vector<1x128xf32>
    %11 = vector.broadcast %10 : vector<1x128xf32> to vector<16x128xf32>
    %12 = arith.mulf %11, %9 : vector<16x128xf32>
    %c0_7 = arith.constant 0 : index
    %c0_8 = arith.constant 0 : index
    %13 = vector.load %arg4[%c0_7, %c0_8] : memref<1x128xf32, #tpu.memory_space<vmem>>, vector<1x128xf32>
    %14 = vector.broadcast %13 : vector<1x128xf32> to vector<16x128xf32>
    %15 = arith.addf %12, %14 : vector<16x128xf32>
    %c0_9 = arith.constant 0 : index
    %c0_10 = arith.constant 0 : index
    %16 = vector.load %arg5[%c0_9, %c0_10] : memref<16x128xf32, #tpu.memory_space<vmem>>, vector<16x128xf32>
    tpu.vector_store %arg5[%c0_9, %c0_10], %15 {strides = array<i32>} : memref<16x128xf32, #tpu.memory_space<vmem>>, vector<16x128xf32>,
    return
  }
  func.func @transform_0(%arg0: i32) -> (i32, i32) {
    %c0_i32 = arith.constant 0 : i32
    %c0_i32_0 = arith.constant 0 : i32
    return %arg0, %c0_i32 : i32, i32
  }
  func.func @transform_1(%arg0: i32) -> (i32, i32) {
    %c0_i32 = arith.constant 0 : i32
    %c0_i32_0 = arith.constant 0 : i32
    %c0_i32_1 = arith.constant 0 : i32
    return %c0_i32, %c0_i32_0 : i32, i32
  }
  func.func @transform_2(%arg0: i32) -> (i32, i32) {
    %c0_i32 = arith.constant 0 : i32
    %c0_i32_0 = arith.constant 0 : i32
    %c0_i32_1 = arith.constant 0 : i32
    return %c0_i32, %c0_i32_0 : i32, i32
  }
  func.func @transform_3(%arg0: i32) -> (i32, i32) {
    %c0_i32 = arith.constant 0 : i32
    %c0_i32_0 = arith.constant 0 : i32
    %c0_i32_1 = arith.constant 0 : i32
    return %c0_i32, %c0_i32_0 : i32, i32
  }
  func.func @transform_4(%arg0: i32) -> (i32, i32) {
    %c0_i32 = arith.constant 0 : i32
    %c0_i32_0 = arith.constant 0 : i32
    return %arg0, %c0_i32 : i32, i32
  }
}

</mosaic_0001>

<bundles_post_ra>
// kernel: tpu_custom_call.1
= control target key start
LH: loop header
LB: loop body
LE: loop exit
PB: predicated region body
PF: predicated region fallthrough
CT: control target
= control target key end

     0   :  { %9 = vsyncpa [#allocation3], 0  ;;  %s349_s0 = inlined_call_operand.hbm [shape: f32[16,128], index: 0, kind: input, shape index: {}]   ;;  %s350_s1 = inlined_call_operand.hbm [shape: f32[128,128], index: 1, kind: input, shape index: {}]   ;;  %s351_s2 = inlined_call_operand.vmem [shape: f32[1,128], index: 2, kind: input, shape index: {}]   ;;  %s352_s3 = inlined_call_operand.vmem [shape: f32[1,128], index: 3, kind: input, shape index: {}]   ;;  %s353_s4 = inlined_call_operand.hbm [shape: f32[16,128], index: 4, kind: output, shape index: {}]  }
   0x1   :  { %10 = vsyncpa [#allocation6], 0 }
   0x2   :  { %11 = vsyncpa [#allocation4], 0  ;;  %s16_s17 = sshll.u32 %s349_s0, 4  ;;  %s295_s18 = smov [#allocation2]   ;;  %s17_s17 = int_to_ptr.hbm [resolvable:$true] %s16_s17 }
   0x3   :  { %s18_s19 = sshll.u32 %s295_s18, 4  ;;  %s29_s22 = sshll.u32 %s350_s1, 4  ;;  %s19_s19 = int_to_ptr.vmem [resolvable:$true] %s18_s19  ;;  %s30_s22 = int_to_ptr.hbm [resolvable:$true] %s29_s22 }
   0x4   :  { %s296_s23 = smov 128   ;;  %s297_s24 = smov 8  }
   0x5   :  { %24 = dma.hbm_to_vmem [thread:$0]  %s17_s17, 256, %s19_s19, [#allocation3], %s296_s23, %s296_s23, %s297_s24  }
   0x6   :  { %s298_s25 = smov [#allocation5]  }
   0x7   :  { %s31_s26 = sshll.u32 %s298_s25, 4  ;;  %s32_s26 = int_to_ptr.vmem [resolvable:$true] %s31_s26 }
   0x8   :  { %37 = dma.hbm_to_vmem [thread:$0]  %s30_s22, 2048, %s32_s26, [#allocation6], %s296_s23, %s296_s23, %s297_s24  }
   0x9   :  { %289 = dma.done.wait [#allocation3], 256  }
   0xa   :  { %290 = vsyncadd [#allocation3], 4294967040 }
   0xb   :  { %291 = dma.done.wait [#allocation6], 2048  }
   0xc   :  { %292 = vsyncadd [#allocation6], 4294965248  ;;  %v67_v0 = vld [vmem:[#allocation5 + $0x78] sm:$0xff]  ;;  %v66_v1 = vld [vmem:[#allocation5 + $0x70] sm:$0xff]  ;;  %s160_s6 = sshll.u32 %s353_s4, 4  ;;  %s161_s6 = int_to_ptr.hbm [resolvable:$true] %s160_s6 }
   0xd   :  { %68 = vmatpush.msra.mxu0 %v67_v0  ;;  %174 = vmatpush.msra.mxu2 %v67_v0  ;;  %v65_v2 = vld [vmem:[#allocation5 + $0x68] sm:$0xff]  ;;  %v64_v3 = vld [vmem:[#allocation5 + $0x60] sm:$0xff]  ;;  %v63_v4 = vld [vmem:[#allocation5 + $0x58] sm:$0xff] }
   0xe   :  { %95 = vmatpush.msra.mxu1 %v67_v0  ;;  %190 = vmatpush.msra.mxu3 %v67_v0  ;;  %v62_v5 = vld [vmem:[#allocation5 + $0x50] sm:$0xff]  ;;  %v61_v6 = vld [vmem:[#allocation5 + $0x48] sm:$0xff]  ;;  %v60_v7 = vld [vmem:[#allocation5 + $0x40] sm:$0xff] }
   0xf   :  { %69 = vmatpush.msra.mxu0 %v66_v1  ;;  %175 = vmatpush.msra.mxu2 %v66_v1  ;;  %v59_v8 = vld [vmem:[#allocation5 + $0x38] sm:$0xff]  ;;  %v58_v9 = vld [vmem:[#allocation5 + $0x30] sm:$0xff]  ;;  %v57_v10 = vld [vmem:[#allocation5 + $0x28] sm:$0xff] }
  0x10   :  { %96 = vmatpush.msra.mxu1 %v66_v1  ;;  %191 = vmatpush.msra.mxu3 %v66_v1  ;;  %v56_v11 = vld [vmem:[#allocation5 + $0x20] sm:$0xff]  ;;  %v55_v12 = vld [vmem:[#allocation5 + $0x18] sm:$0xff]  ;;  %v54_v13 = vld [vmem:[#allocation5 + $0x10] sm:$0xff] }
  0x11   :  { %70 = vmatpush.msra.mxu0 %v65_v2  ;;  %176 = vmatpush.msra.mxu2 %v65_v2  ;;  %v53_v14 = vld [vmem:[#allocation5 + $0x8] sm:$0xff]  ;;  %v52_v15 = vld [vmem:[#allocation5] sm:$0xff]  ;;  %v50_v16 = vld [vmem:[#allocation2] sm:$0xff] }
  0x12   :  { %97 = vmatpush.msra.mxu1 %v65_v2  ;;  %192 = vmatpush.msra.mxu3 %v65_v2  ;;  %v51_v17 = vld [vmem:[#allocation2 + $0x8] sm:$0xff]  ;;  %v211_v34 = vld [vmem:[%s351_s2] ss:$0 sm:$0xff]  ;;  %s299_s2 = smov [#allocation7]  }
  0x13   :  { %71 = vmatpush.msra.mxu0 %v64_v3  ;;  %177 = vmatpush.msra.mxu2 %v64_v3  ;;  %v212_v38 = vld [vmem:[%s352_s3] ss:$0 sm:$0xff]  ;;  %s158_s29 = sshll.u32 %s299_s2, 4  ;;  %s159_s29 = int_to_ptr.vmem [resolvable:$true] %s158_s29 }
  0x14   :  { %98 = vmatpush.msra.mxu1 %v64_v3  ;;  %193 = vmatpush.msra.mxu3 %v64_v3 }
  0x15   :  { %72 = vmatpush.msra.mxu0 %v63_v4  ;;  %178 = vmatpush.msra.mxu2 %v63_v4 }
  0x16   :  { %99 = vmatpush.msra.mxu1 %v63_v4  ;;  %194 = vmatpush.msra.mxu3 %v63_v4 }
  0x17   :  { %73 = vmatpush.msra.mxu0 %v62_v5  ;;  %179 = vmatpush.msra.mxu2 %v62_v5 }
  0x18   :  { %100 = vmatpush.msra.mxu1 %v62_v5  ;;  %195 = vmatpush.msra.mxu3 %v62_v5 }
  0x19   :  { %74 = vmatpush.msra.mxu0 %v61_v6  ;;  %180 = vmatpush.msra.mxu2 %v61_v6 }
  0x1a   :  { %101 = vmatpush.msra.mxu1 %v61_v6  ;;  %196 = vmatpush.msra.mxu3 %v61_v6 }
  0x1b   :  { %75 = vmatpush.msra.mxu0 %v60_v7  ;;  %181 = vmatpush.msra.mxu2 %v60_v7 }
  0x1c   :  { %102 = vmatpush.msra.mxu1 %v60_v7  ;;  %197 = vmatpush.msra.mxu3 %v60_v7 }
  0x1d   :  { %76 = vmatpush.msra.mxu0 %v59_v8  ;;  %182 = vmatpush.msra.mxu2 %v59_v8 }
  0x1e   :  { %103 = vmatpush.msra.mxu1 %v59_v8  ;;  %198 = vmatpush.msra.mxu3 %v59_v8 }
  0x1f   :  { %77 = vmatpush.msra.mxu0 %v58_v9  ;;  %183 = vmatpush.msra.mxu2 %v58_v9 }
  0x20   :  { %104 = vmatpush.msra.mxu1 %v58_v9  ;;  %199 = vmatpush.msra.mxu3 %v58_v9 }
  0x21   :  { %78 = vmatpush.msra.mxu0 %v57_v10  ;;  %184 = vmatpush.msra.mxu2 %v57_v10 }
  0x22   :  { %105 = vmatpush.msra.mxu1 %v57_v10  ;;  %200 = vmatpush.msra.mxu3 %v57_v10 }
  0x23   :  { %79 = vmatpush.msra.mxu0 %v56_v11  ;;  %185 = vmatpush.msra.mxu2 %v56_v11 }
  0x24   :  { %106 = vmatpush.msra.mxu1 %v56_v11  ;;  %201 = vmatpush.msra.mxu3 %v56_v11 }
  0x25   :  { %80 = vmatpush.msra.mxu0 %v55_v12  ;;  %186 = vmatpush.msra.mxu2 %v55_v12 }
  0x26   :  { %107 = vmatpush.msra.mxu1 %v55_v12  ;;  %202 = vmatpush.msra.mxu3 %v55_v12 }
  0x27   :  { %81 = vmatpush.msra.mxu0 %v54_v13  ;;  %187 = vmatpush.msra.mxu2 %v54_v13 }
  0x28   :  { %108 = vmatpush.msra.mxu1 %v54_v13  ;;  %203 = vmatpush.msra.mxu3 %v54_v13 }
  0x29   :  { %82 = vmatpush.msra.mxu0 %v53_v14  ;;  %188 = vmatpush.msra.mxu2 %v53_v14 }
  0x2a   :  { %109 = vmatpush.msra.mxu1 %v53_v14  ;;  %204 = vmatpush.msra.mxu3 %v53_v14 }
  0x2b   :  { %83 = vmatpush.msra.mxu0 %v52_v15  ;;  %189 = vmatpush.msra.mxu2 %v52_v15 }
  0x2c   :  { %84 = vmatmul.f32.vlgmr.msra.gmra.mxu0 %v50_v16  ;;  %87 = vmatmul.f32.vlgmr.msra.gmra.mxu2 %v51_v17 }
  0x2d   :  { %110 = vmatpush.msra.mxu1 %v52_v15  ;;  %205 = vmatpush.msra.mxu3 %v52_v15 }
  0xa9   :  { %v85_v18 = vpop.f32.mrf.mxu0 }
  0xaa   :  { %v91_v19 = vsub.f32 %v50_v16, %v85_v18 }
  0xac   :  { %v93_v20 = vmul.f32 %v91_v19, %v91_v19 }
  0xae   :  { %111 = vmatmul.f32.vlgmr.msra.gmra.mxu1 %v93_v20 }
  0xaf   :  { %v88_v21 = vpop.f32.mrf.mxu2 }
  0xb0   :  { %v92_v22 = vsub.f32 %v51_v17, %v88_v21 }
  0xb2   :  { %v94_v23 = vmul.f32 %v92_v22, %v92_v22 }
  0xb4   :  { %114 = vmatmul.f32.vlgmr.msra.gmra.mxu3 %v94_v23 }
 0x12b   :  { %v112_v24 = vpop.f32.mrf.mxu1 }
 0x12c   :  { %v113_v25 = vadd.f32 1e-12, %v112_v24 }
 0x12e   :  { %213 = vrsqrt.f32 %v113_v25  ;;  %vm124_vm0 = vweird.f32 %v113_v25 }
 0x134   :  { %v214_v26 = vpop.eup %213 }
 0x135   :  { %v119_v27 = vmul.f32 %v214_v26, %v113_v25  ;;  %vm125_vm1 = vweird.f32 %v214_v26 }
 0x136   :  { %vm126_vm2 = vmor %vm124_vm0, %vm125_vm1 }
 0x137   :  { %v120_v28 = vmul.f32 %v214_v26, %v119_v27  ;;  %v115_v29 = vpop.f32.mrf.mxu3 }
 0x138   :  { %v116_v30 = vadd.f32 1e-12, %v115_v29 }
 0x139   :  { %v121_v31 = vmul.f32 0.5, %v120_v28 }
 0x13a   :  { %215 = vrsqrt.f32 %v116_v30  ;;  %vm134_vm4 = vweird.f32 %v116_v30 }
 0x13b   :  { %v122_v32 = vsub.f32 1.5, %v121_v31 }
 0x13d   :  { %v123_v33 = vmul.f32 %v214_v26, %v122_v32 }
 0x13f   :  { %v127_v35 = vsel %vm126_vm2, %v214_v26, %v123_v33 }
 0x140   :  { %v216_v36 = vpop.eup %215  ;;  %v138_v37 = vmul.f32 %v127_v35, %v91_v19 }
 0x141   :  { %v129_v39 = vmul.f32 %v216_v36, %v116_v30  ;;  %vm135_vm3 = vweird.f32 %v216_v36 }
 0x142   :  { %v144_v40 = vmul.f32 %v211_v34, %v138_v37  ;;  %vm136_vm5 = vmor %vm134_vm4, %vm135_vm3 }
 0x143   :  { %v130_v41 = vmul.f32 %v216_v36, %v129_v39 }
 0x144   :  { %v150_v42 = vadd.f32 %v212_v38, %v144_v40 }
 0x145   :  { %v131_v43 = vmul.f32 0.5, %v130_v41 }
 0x146   :  { %152 = vst [vmem:[#allocation7] sm:$0xff] %v150_v42 }
 0x147   :  { %v132_v44 = vsub.f32 1.5, %v131_v43 }
 0x149   :  { %v133_v45 = vmul.f32 %v216_v36, %v132_v44 }
 0x14b   :  { %v137_v46 = vsel %vm136_vm5, %v216_v36, %v133_v45 }
 0x14c   :  { %v139_v47 = vmul.f32 %v137_v46, %v92_v22 }
 0x14e   :  { %v145_v48 = vmul.f32 %v211_v34, %v139_v47 }
 0x150   :  { %v151_v49 = vadd.f32 %v212_v38, %v145_v48 }
 0x152   :  { %153 = vst [vmem:[#allocation7 + $0x8] sm:$0xff] %v151_v49 }
 0x153   :  { %166 = dma.vmem_to_hbm [thread:$0]  %s159_s29, 256, %s161_s6, [#allocation4], %s296_s23, %s296_s23, %s297_s24  }
 0x154   :  { %293 = dma.done.wait [#allocation4], 256  }
 0x155   :  { %294 = vsyncadd [#allocation4], 4294967040 }
 0x156   :  { %171 = vsyncpa [#allocation3], 1 }
 0x157   :  { %172 = vsyncpa [#allocation6], 1 }
 0x158   :  { %173 = vsyncpa [#allocation4], 1 }

</bundles_post_ra>
